<compile_context>
chip_gen: v5e
topology: v5e:2x2
jax: 0.10.0
libtpu: 0.0.40
codegen_flags: <defaults>
</compile_context>

<pallas_src>
import jax
import jax.numpy as jnp
from jax import lax
from jax.experimental import pallas as pl
from jax.experimental.pallas import tpu as pltpu


# ----------------------------------------------------------------------------
# Pallas kernel: fused MLP (tanh hidden layers) + softmax head.
# x_ref is batch-major (TB, state_dim); out_ref is feature-major (A, TB).
# Weights are PyTorch-native (out_dim, in_dim); biases are (out_dim, 1).
# ----------------------------------------------------------------------------
def _policy_kernel(x_ref, w1_ref, b1_ref, w2_ref, b2_ref, w3_ref, b3_ref,
                   out_ref):
    x = x_ref[...]                                      # (TB, state_dim)

    # Hidden layer 1: tanh(W1 @ X^T + b1) -> (h1, TB).
    # Contract the feature axis of both operands (dim 1 of W1, dim 1 of X).
    h1 = jnp.tanh(
        lax.dot_general(w1_ref[...], x,
                        dimension_numbers=(((1,), (1,)), ((), ())),
                        preferred_element_type=jnp.float32)
        + b1_ref[...])

    # Hidden layer 2: tanh(W2 @ H1 + b2) -> (h2, TB)
    h2 = jnp.tanh(
        jnp.dot(w2_ref[...], h1, preferred_element_type=jnp.float32)
        + b2_ref[...])

    # Output layer (identity activation): logits = W3 @ H2 + b3 -> (A, TB)
    logits = (jnp.dot(w3_ref[...], h2, preferred_element_type=jnp.float32)
              + b3_ref[...])

    # Softmax over the action dimension (axis 0 = sublanes), max-stabilized.
    m = jnp.max(logits, axis=0, keepdims=True)
    e = jnp.exp(logits - m)
    denom = jnp.sum(e, axis=0, keepdims=True)
    # Exact reciprocal on the tiny (1, TB) row: rows sum to 1 to f32 eps.
    out_ref[...] = e * (1.0 / denom)


def _pick_batch_tile(batch):
    """Fat 128..512-lane batch tiles; aim for >= 2 grid steps (v7x 2-TC)."""
    per_step = pl.cdiv(batch, 2)
    tile = 128 * pl.cdiv(per_step, 128)
    return int(min(512, max(128, tile)))


# ----------------------------------------------------------------------------
# Wrapper: (B, state_dim) f32 -> (B, action_dim) f32 probabilities.
# ----------------------------------------------------------------------------
def categorical_mlp_policy_forward(state, params, *, tb=None):
    w1, b1 = params["w1"], params["b1"]     # (h1, s),  (h1, 1)
    w2, b2 = params["w2"], params["b2"]     # (h2, h1), (h2, 1)
    w3, b3 = params["w3"], params["b3"]     # (A,  h2), (A,  1)

    B, state_dim = state.shape
    h1 = w1.shape[0]
    h2 = w2.shape[0]
    action_dim = w3.shape[0]

    if tb is None:
        tb = _pick_batch_tile(B)
    n_tiles = pl.cdiv(B, tb)

    x = state.astype(jnp.float32)           # (B, state_dim), batch-major

    # Advisory cost estimate so XLA can overlap this call with neighbors.
    flops = 2 * B * (state_dim * h1 + h1 * h2 + h2 * action_dim)
    transcendentals = B * (h1 + h2 + action_dim)         # tanh + exp
    weight_bytes = 4 * (w1.size + b1.size + w2.size + b2.size
                        + w3.size + b3.size)
    bytes_accessed = 4 * B * (state_dim + action_dim) + weight_bytes
    cost = pl.CostEstimate(flops=flops,
                           transcendentals=transcendentals,
                           bytes_accessed=bytes_accessed)

    full_resident = lambda shape: pl.BlockSpec(shape, lambda i: (0, 0))

    probs_t = pl.pallas_call(
        _policy_kernel,
        out_shape=jax.ShapeDtypeStruct((action_dim, B), jnp.float32),
        grid=(n_tiles,),
        in_specs=[
            # State tile: batch-major, tiled along the batch axis only.
            pl.BlockSpec((tb, state_dim), lambda i: (i, 0)),
            # Weights / biases: same (0, 0) block every step -> VMEM-resident.
            full_resident(w1.shape), full_resident(b1.shape),
            full_resident(w2.shape), full_resident(b2.shape),
            full_resident(w3.shape), full_resident(b3.shape),
        ],
        # Output kept feature-major (lane-dense stores); transposed in XLA.
        out_specs=pl.BlockSpec((action_dim, tb), lambda i: (0, i)),
        compiler_params=pltpu.CompilerParams(
            dimension_semantics=("parallel",)),
        cost_estimate=cost,
    )(x, w1, b1, w2, b2, w3, b3)

    # Back to (B, action_dim); the (A, B) transpose in XLA is cheap.
    return jnp.transpose(probs_t)


# ----------------------------------------------------------------------------
# Deterministic parameter initialization (orthogonal, gain=0.01, zero bias),
# mirroring the module's orthogonal_init(m, 'policy') pass. Weights are kept
# in PyTorch-native (out_dim, in_dim) layout; biases are (out_dim, 1).
# ----------------------------------------------------------------------------
def _orthogonal(key, out_dim, in_dim, gain=0.01):
    n = max(in_dim, out_dim)
    a = jax.random.normal(key, (n, n), dtype=jnp.float32)
    q, r = jnp.linalg.qr(a)
    q = q * jnp.sign(jnp.diagonal(r))  # make decomposition unique
    return gain * q[:out_dim, :in_dim]


def init_params(key, state_dim, hidden_dims, action_dim):
    dims = [state_dim] + list(hidden_dims) + [action_dim]
    params = {}
    keys = jax.random.split(key, len(dims) - 1)
    for i, (din, dout) in enumerate(zip(dims[:-1], dims[1:]), start=1):
        params[f"w{i}"] = _orthogonal(keys[i - 1], dout, din)   # (out, in)
        params[f"b{i}"] = jnp.zeros((dout, 1), dtype=jnp.float32)
    return params


# TODO(synk): Categorical sampling / select_action (torch.distributions) is a
# host-side op on the returned probs and is intentionally not in the kernel.

if __name__ == "__main__":
    # Small shapes consistent with the module's forward. B=200 deliberately
    # exercises the ragged last batch block (tile picker gives tb=128 -> 2
    # grid steps, the second of which is ragged).
    batch = 200
    state_dim = 16
    hidden_dims = [32, 32]
    action_dim = 8

    key = jax.random.PRNGKey(0)
    k_state, k_params = jax.random.split(key)

    state = jax.random.normal(k_state, (batch, state_dim), dtype=jnp.float32)
    params = init_params(k_params, state_dim, hidden_dims, action_dim)

    probs = categorical_mlp_policy_forward(state, params)
    probs = jax.block_until_ready(probs)

    # Sanity checks: correct shape, valid probability simplex (exact
    # normalization now that the softmax uses an exact reciprocal).
    assert probs.shape == (batch, action_dim)
    assert bool(jnp.all(probs >= 0.0))
    assert bool(jnp.allclose(jnp.sum(probs, axis=-1), 1.0, atol=1e-5))

    # Cross-check against plain-JAX reference (PyTorch weight convention).
    def ref_forward(x, p):
        hp = jax.lax.Precision.HIGHEST
        h = jnp.tanh(jnp.dot(x, p["w1"].T, precision=hp) + p["b1"].T)
        h = jnp.tanh(jnp.dot(h, p["w2"].T, precision=hp) + p["b2"].T)
        logits = jnp.dot(h, p["w3"].T, precision=hp) + p["b3"].T
        return jax.nn.softmax(logits, axis=-1)

    ref = ref_forward(state, params)
    assert bool(jnp.allclose(probs, ref, atol=1e-4, rtol=1e-4))

    print("KERNEL_OK")
</pallas_src>

<mosaic_0001>
module attributes {stable_mosaic.version = 11 : i64} {
  func.func @_policy_kernel(%arg0: i32, %arg1: memref<128x16xf32, #tpu.memory_space<vmem>>, %arg2: memref<32x16xf32, #tpu.memory_space<vmem>>, %arg3: memref<32x1xf32, #tpu.memory_space<vmem>>, %arg4: memref<32x32xf32, #tpu.memory_space<vmem>>, %arg5: memref<32x1xf32, #tpu.memory_space<vmem>>, %arg6: memref<8x32xf32, #tpu.memory_space<vmem>>, %arg7: memref<8x1xf32, #tpu.memory_space<vmem>>, %arg8: memref<8x128xf32, #tpu.memory_space<vmem>>) attributes {dimension_semantics = [#tpu.dimension_semantics<parallel>], iteration_bounds = array<i64: 2>, scalar_prefetch = 0 : i64, scratch_operands = 0 : i64, tpu.core_type = #tpu.core_type<tc>, window_params = [{transform_indices = @transform_0, window_bounds = array<i64: 128, 16>}, {pipeline_mode = #tpu.pipeline_mode<synchronous>, transform_indices = @transform_1, window_bounds = array<i64: 32, 16>}, {pipeline_mode = #tpu.pipeline_mode<synchronous>, transform_indices = @transform_2, window_bounds = array<i64: 32, 1>}, {pipeline_mode = #tpu.pipeline_mode<synchronous>, transform_indices = @transform_3, window_bounds = array<i64: 32, 32>}, {pipeline_mode = #tpu.pipeline_mode<synchronous>, transform_indices = @transform_4, window_bounds = array<i64: 32, 1>}, {pipeline_mode = #tpu.pipeline_mode<synchronous>, transform_indices = @transform_5, window_bounds = array<i64: 8, 32>}, {pipeline_mode = #tpu.pipeline_mode<synchronous>, transform_indices = @transform_6, window_bounds = array<i64: 8, 1>}, {transform_indices = @transform_7, window_bounds = array<i64: 8, 128>}]} {
    %c0 = arith.constant 0 : index
    %c0_0 = arith.constant 0 : index
    %0 = vector.load %arg1[%c0, %c0_0] : memref<128x16xf32, #tpu.memory_space<vmem>>, vector<128x16xf32>
    %c0_1 = arith.constant 0 : index
    %c0_2 = arith.constant 0 : index
    %1 = vector.load %arg2[%c0_1, %c0_2] : memref<32x16xf32, #tpu.memory_space<vmem>>, vector<32x16xf32>
    %cst = arith.constant dense<0.000000e+00> : vector<32x128xf32>
    %2 = tpu.matmul %1, %0, %cst {dimension_numbers = #tpu.dot_dimension_numbers<[1], [1], [0], [0], [0, 0, 1, 0], [], []>} : vector<32x16xf32>, vector<128x16xf32>, vector<32x128xf32> -> vector<32x128xf32>
    %c0_3 = arith.constant 0 : index
    %c0_4 = arith.constant 0 : index
    %3 = vector.load %arg3[%c0_3, %c0_4] : memref<32x1xf32, #tpu.memory_space<vmem>>, vector<32x1xf32>
    %4 = vector.broadcast %3 : vector<32x1xf32> to vector<32x128xf32>
    %5 = arith.addf %2, %4 : vector<32x128xf32>
    %6 = math.tanh %5 : vector<32x128xf32>
    %c0_5 = arith.constant 0 : index
    %c0_6 = arith.constant 0 : index
    %7 = vector.load %arg4[%c0_5, %c0_6] : memref<32x32xf32, #tpu.memory_space<vmem>>, vector<32x32xf32>
    %cst_7 = arith.constant dense<0.000000e+00> : vector<32x128xf32>
    %8 = tpu.matmul %7, %6, %cst_7 {dimension_numbers = #tpu.dot_dimension_numbers<[1], [0], [0], [1], [0, 0, 1, 1], [], []>} : vector<32x32xf32>, vector<32x128xf32>, vector<32x128xf32> -> vector<32x128xf32>
    %c0_8 = arith.constant 0 : index
    %c0_9 = arith.constant 0 : index
    %9 = vector.load %arg5[%c0_8, %c0_9] : memref<32x1xf32, #tpu.memory_space<vmem>>, vector<32x1xf32>
    %10 = vector.broadcast %9 : vector<32x1xf32> to vector<32x128xf32>
    %11 = arith.addf %8, %10 : vector<32x128xf32>
    %12 = math.tanh %11 : vector<32x128xf32>
    %c0_10 = arith.constant 0 : index
    %c0_11 = arith.constant 0 : index
    %13 = vector.load %arg6[%c0_10, %c0_11] : memref<8x32xf32, #tpu.memory_space<vmem>>, vector<8x32xf32>
    %cst_12 = arith.constant dense<0.000000e+00> : vector<8x128xf32>
    %14 = tpu.matmul %13, %12, %cst_12 {dimension_numbers = #tpu.dot_dimension_numbers<[1], [0], [0], [1], [0, 0, 1, 1], [], []>} : vector<8x32xf32>, vector<32x128xf32>, vector<8x128xf32> -> vector<8x128xf32>
    %c0_13 = arith.constant 0 : index
    %c0_14 = arith.constant 0 : index
    %15 = vector.load %arg7[%c0_13, %c0_14] : memref<8x1xf32, #tpu.memory_space<vmem>>, vector<8x1xf32>
    %16 = vector.broadcast %15 : vector<8x1xf32> to vector<8x128xf32>
    %17 = arith.addf %14, %16 : vector<8x128xf32>
    %cst_15 = arith.constant dense<0xFF800000> : vector<128xf32>
    %18 = vector.multi_reduction <maximumf>, %17, %cst_15 [0] : vector<8x128xf32> to vector<128xf32>
    %19 = vector.shape_cast %18 : vector<128xf32> to vector<1x128xf32>
    %20 = vector.broadcast %19 : vector<1x128xf32> to vector<8x128xf32>
    %21 = arith.subf %17, %20 : vector<8x128xf32>
    %22 = math.exp %21 : vector<8x128xf32>
    %cst_16 = arith.constant dense<0.000000e+00> : vector<128xf32>
    %23 = vector.multi_reduction <add>, %22, %cst_16 [0] : vector<8x128xf32> to vector<128xf32>
    %24 = vector.shape_cast %23 : vector<128xf32> to vector<1x128xf32>
    %cst_17 = arith.constant 1.000000e+00 : f32
    %25 = vector.broadcast %cst_17 : f32 to vector<1x128xf32>
    %26 = arith.divf %25, %24 : vector<1x128xf32>
    %27 = vector.broadcast %26 : vector<1x128xf32> to vector<8x128xf32>
    %28 = arith.mulf %22, %27 : vector<8x128xf32>
    %c0_18 = arith.constant 0 : index
    %c0_19 = arith.constant 0 : index
    %29 = vector.load %arg8[%c0_18, %c0_19] : memref<8x128xf32, #tpu.memory_space<vmem>>, vector<8x128xf32>
    tpu.vector_store %arg8[%c0_18, %c0_19], %28 {strides = array<i32>} : memref<8x128xf32, #tpu.memory_space<vmem>>, vector<8x128xf32>,
    return
  }
  func.func @transform_0(%arg0: i32) -> (i32, i32) {
    %c0_i32 = arith.constant 0 : i32
    %c0_i32_0 = arith.constant 0 : i32
    return %arg0, %c0_i32 : i32, i32
  }
  func.func @transform_1(%arg0: i32) -> (i32, i32) {
    %c0_i32 = arith.constant 0 : i32
    %c0_i32_0 = arith.constant 0 : i32
    %c0_i32_1 = arith.constant 0 : i32
    return %c0_i32, %c0_i32_0 : i32, i32
  }
  func.func @transform_2(%arg0: i32) -> (i32, i32) {
    %c0_i32 = arith.constant 0 : i32
    %c0_i32_0 = arith.constant 0 : i32
    %c0_i32_1 = arith.constant 0 : i32
    return %c0_i32, %c0_i32_0 : i32, i32
  }
  func.func @transform_3(%arg0: i32) -> (i32, i32) {
    %c0_i32 = arith.constant 0 : i32
    %c0_i32_0 = arith.constant 0 : i32
    %c0_i32_1 = arith.constant 0 : i32
    return %c0_i32, %c0_i32_0 : i32, i32
  }
  func.func @transform_4(%arg0: i32) -> (i32, i32) {
    %c0_i32 = arith.constant 0 : i32
    %c0_i32_0 = arith.constant 0 : i32
    %c0_i32_1 = arith.constant 0 : i32
    return %c0_i32, %c0_i32_0 : i32, i32
  }
  func.func @transform_5(%arg0: i32) -> (i32, i32) {
    %c0_i32 = arith.constant 0 : i32
    %c0_i32_0 = arith.constant 0 : i32
    %c0_i32_1 = arith.constant 0 : i32
    return %c0_i32, %c0_i32_0 : i32, i32
  }
  func.func @transform_6(%arg0: i32) -> (i32, i32) {
    %c0_i32 = arith.constant 0 : i32
    %c0_i32_0 = arith.constant 0 : i32
    %c0_i32_1 = arith.constant 0 : i32
    return %c0_i32, %c0_i32_0 : i32, i32
  }
  func.func @transform_7(%arg0: i32) -> (i32, i32) {
    %c0_i32 = arith.constant 0 : i32
    %c0_i32_0 = arith.constant 0 : i32
    return %c0_i32, %arg0 : i32, i32
  }
}

</mosaic_0001>

<bundles_post_ra>
// kernel: tpu_custom_call.1
= control target key start
LH: loop header
LB: loop body
LE: loop exit
PB: predicated region body
PF: predicated region fallthrough
CT: control target
= control target key end

     0   :  { %12 = vsyncpa [#allocation3], 0  ;;  %s1065_s0 = inlined_call_operand.vmem [shape: f32[200,16], index: 0, kind: input, shape index: {}]   ;;  %s1066_s1 = inlined_call_operand.vmem [shape: f32[32,16], index: 1, kind: input, shape index: {}]   ;;  %s1067_s2 = inlined_call_operand.vmem [shape: f32[32,1], index: 2, kind: input, shape index: {}]   ;;  %s1068_s3 = inlined_call_operand.vmem [shape: f32[32,32], index: 3, kind: input, shape index: {}]   ;;  %s1069_s4 = inlined_call_operand.vmem [shape: f32[32,1], index: 4, kind: input, shape index: {}]   ;;  %s1070_s5 = inlined_call_operand.vmem [shape: f32[8,32], index: 5, kind: input, shape index: {}]   ;;  %s1071_s6 = inlined_call_operand.vmem [shape: f32[8,1], index: 6, kind: input, shape index: {}]   ;;  %s1072_s7 = inlined_call_operand.hbm [shape: f32[8,200], index: 7, kind: output, shape index: {}]  }
   0x1   :  { %14 = vsyncpa [#allocation3 + $0x1], 0  ;;  %s868_s24 = smov 0   ;;  %s870_s25 = smov 0  }
   0x2   :  { %s872_s26 = smov 0   ;;  %s874_s27 = smov 0  }
   0x3 LB: > { %s889_s28 = sadd.s32 4294967295, %s825_s27   ;;  %s648_s29 = sadd.s32 4294967294, %s825_s27   ;;  %s825_s27 = sphi %s874_s27, %s1078_s27   ;;  %s821_s26 = sphi %s872_s26, %s1077_s26   ;;  %s817_s25 = sphi %s870_s25, %s1076_s25   ;;  %s813_s24 = sphi %s868_s24, %s1075_s24  }
   0x4   : > { %s893_s30 = sadd.s32 1, %s825_s27   ;;  %s179_s8 = sadd.s32 1, %s821_s26 }
   0x5   : > { %s176_s9 = ssub.s32 %s825_s27, %s893_s30  ;;  %p189_p0 = scmp.ne.s32.totalorder %s821_s26, %s817_s25 }
   0x6   : > { %p177_p1 = scmp.eq.s32.totalorder %s176_s9, 0  ;;  %p190_p2 = scmp.eq.s32.totalorder %s889_s28, 1 }
   0x7   : > { %p195_p3 = scmp.ne.s32.totalorder %s817_s25, %s813_s24  ;;  %p196_p4 = scmp.eq.s32.totalorder %s648_s29, 1 }
   0x8   : > { %s904_s10 = scalar_select %p177_p1, %s821_s26, %s179_s8  }
   0x9   : > { %p906_p5 = por %p190_p2, %p189_p0  ;;  %p910_p6 = por %p196_p4, %p195_p3 }
   0xa   : > { %p651_p7 = scmp.ge.s32.totalorder %s825_s27, 1  ;;  %p249_p8 = scmp.lt.s32.totalorder %s825_s27, 3 }
   0xc   : > { %p250_p9 = pnand %p651_p7, %p249_p8 }
   0xd   : > { %s653_s13 = sshll.u32 (!%p250_p9), %s889_s28, 4  ;;  %s282_s9 = sand.u32 (!%p250_p9), 1, %s817_s25  }
   0xe   : > { %253 = sbr.rel (%p250_p9) target bundleno = 607 (0x25f), region = 48  ;;  %p290_p10 = scmp.lt.s32.totalorder (!%p250_p9), %s653_s13, 24 }
   0xf   : > { %s783_s8 = scalar_lea.hbm (!%p250_p9), %s1072_s7, 16 }
  0x13   : > { %s1080_s13 = smov (!%p290_p10, %s653_s13), 24  ;;  %vm343_vm0 = vcmask 130048   ;;  %v322_v11 = vld [vmem:[%s1067_s2 + $0x18] sm:$0xff]  ;;  %v320_v12 = vld [vmem:[%s1067_s2 + $0x8] sm:$0xff]  ;;  %v827_v14 = vmov 0   ;;  %v321_v16 = vld [vmem:[%s1067_s2 + $0x10] sm:$0xff] }
  0x14   : > { %s654_s14 = sshll.u32 %s1080_s13, 3  ;;  %740 = vset.pattern.permute.xlu0 %v827_v14  ;;  %741 = vset.pattern.permute.xlu1 %v827_v14  ;;  %v319_v17 = vld [vmem:[%s1067_s2] sm:$0xff]  ;;  %v442_v20 = vld [vmem:[%s1069_s4 + $0x8] sm:$0xff]  ;;  %v317_v25 = vld [vmem:[%s1066_s1 + $0x10] sm:$0xff]  ;;  %vm465_vm1 = vcmask 261120   ;;  %s652_s13 = sshll.u32 %s282_s9, 3 }
  0x15   : > { %s920_s17 = scalar_lea.vmem %s1065_s0, %s654_s14  ;;  %340 = vperm.xlu0 %740, %v322_v11   ;;  %330 = vperm.xlu1 %741, %v320_v12   ;;  %v441_v21 = vld [vmem:[%s1069_s4] sm:$0xff]  ;;  %v316_v23 = vld [vmem:[%s1066_s1 + $0x8] sm:$0xff]  ;;  %v318_v26 = vld [vmem:[%s1066_s1 + $0x18] sm:$0xff]  ;;  %s681_s14 = sshll.u32 %s889_s28, 3 }
  0x16   : > { %v314_v0 = vld [vmem:[%s920_s17 + $0x78] sm:$0xff]  ;;  %v313_v1 = vld [vmem:[%s920_s17 + $0x70] sm:$0xff]  ;;  %v312_v2 = vld [vmem:[%s920_s17 + $0x68] sm:$0xff]  ;;  %742 = vset.pattern.permute.xlu2 %v827_v14  ;;  %s584_s18 = scalar_lea.hbm %s1072_s7, %s681_s14  ;;  %s284_s19 = scalar_lea.vmem [#allocation2], %s652_s13 }
  0x17   : > { %684 = vmatpush.xpose.msk.msra.mxu3 %vm343_vm0, %v314_v0  ;;  %655 = vmatpush.xpose.msk.msra.mxu0 %vm343_vm0, %v314_v0  ;;  %v311_v3 = vld [vmem:[%s920_s17 + $0x60] sm:$0xff]  ;;  %v310_v4 = vld [vmem:[%s920_s17 + $0x58] sm:$0xff]  ;;  %v309_v5 = vld [vmem:[%s920_s17 + $0x50] sm:$0xff]  ;;  %s586_s20 = sshll.u32 %s284_s19, 4  ;;  %s588_s21 = sshll.u32 %s584_s18, 4  ;;  %s587_s20 = int_to_ptr.vmem [resolvable:$true] %s586_s20  ;;  %s589_s21 = int_to_ptr.hbm [resolvable:$true] %s588_s21 }
  0x18   : > { %v308_v6 = vld [vmem:[%s920_s17 + $0x48] sm:$0xff]  ;;  %v307_v7 = vld [vmem:[%s920_s17 + $0x40] sm:$0xff]  ;;  %v306_v8 = vld [vmem:[%s920_s17 + $0x38] sm:$0xff]  ;;  %s574_s28 = scalar_lea.sflag [#allocation3], %s282_s9 }
  0x19   : > { %v305_v9 = vld [vmem:[%s920_s17 + $0x30] sm:$0xff]  ;;  %v304_v10 = vld [vmem:[%s920_s17 + $0x28] sm:$0xff]  ;;  %v303_v13 = vld [vmem:[%s920_s17 + $0x20] sm:$0xff] }
  0x1a   : > { %v302_v15 = vld [vmem:[%s920_s17 + $0x18] sm:$0xff]  ;;  %v301_v18 = vld [vmem:[%s920_s17 + $0x10] sm:$0xff]  ;;  %v300_v19 = vld [vmem:[%s920_s17 + $0x8] sm:$0xff] }
  0x1b   : > { %685 = vmatpush.xpose.msk.msra.mxu3 %vm343_vm0, %v313_v1  ;;  %656 = vmatpush.xpose.msk.msra.mxu0 %vm343_vm0, %v313_v1  ;;  %v299_v22 = vld [vmem:[%s920_s17] sm:$0xff]  ;;  %v444_v40 = vld [vmem:[%s1069_s4 + $0x18] sm:$0xff]  ;;  %v443_v45 = vld [vmem:[%s1069_s4 + $0x10] sm:$0xff]  ;;  %s777_s17 = sshra.s32 %s589_s21, 4  ;;  %s778_s17 = int_to_ptr.hbm [resolvable:$true] %s777_s17 }
  0x1c   : > { %v315_v24 = vld [vmem:[%s1066_s1] sm:$0xff]  ;;  %462 = vperm.xlu2 %742, %v444_v40   ;;  %v438_v46 = vld [vmem:[%s1068_s3 + $0x8] sm:$0xff]  ;;  %v439_v48 = vld [vmem:[%s1068_s3 + $0x10] sm:$0xff]  ;;  %s779_s22 = scalar_lea.hbm %s778_s17, 8  ;;  %p784_p0 = scmp.lt.s32.totalorder %s778_s17, %s1072_s7 }
  0x1d   : > { %335 = vperm.xlu0 %740, %v321_v16   ;;  %325 = vperm.xlu1 %741, %v319_v17   ;;  %v437_v43 = vld [vmem:[%s1068_s3] sm:$0xff]  ;;  %v440_v49 = vld [vmem:[%s1068_s3 + $0x18] sm:$0xff]  ;;  %p780_p11 = scmp.ne.s32.totalorder %s778_s17, %s779_s22  ;;  %p785_p1 = scmp.lt.s32.totalorder %s783_s8, %s779_s22 }
  0x1e   : > { %v512_v47 = vld [vmem:[%s1071_s6] sm:$0xff] }
  0x1f   : > { %686 = vmatpush.xpose.msk.msra.mxu3 %vm343_vm0, %v312_v2  ;;  %657 = vmatpush.xpose.msk.msra.mxu0 %vm343_vm0, %v312_v2  ;;  %v511_v1 = vld [vmem:[%s1070_s5] sm:$0xff]  ;;  %p781_p12 = pnand %p780_p11, %p906_p5  ;;  %p786_p2 = por %p785_p1, %p784_p0 }
  0x21   : > { %p782_p13 = pneg %p781_p12 }
  0x23   : > { %687 = vmatpush.xpose.msk.msra.mxu3 %vm343_vm0, %v311_v3  ;;  %658 = vmatpush.xpose.msk.msra.mxu0 %vm343_vm0, %v311_v3  ;;  %p787_p3 = pnand %p786_p2, %p782_p13 }
  0x24   : > { %457 = vperm.xlu2 %742, %v443_v45  }
  0x25   : > { %452 = vperm.xlu0 %740, %v442_v20   ;;  %447 = vperm.xlu1 %741, %v441_v21  }
  0x27   : > { %688 = vmatpush.xpose.msk.msra.mxu3 %vm343_vm0, %v310_v4  ;;  %659 = vmatpush.xpose.msk.msra.mxu0 %vm343_vm0, %v310_v4 }
  0x2b   : > { %689 = vmatpush.xpose.msk.msra.mxu3 %vm343_vm0, %v309_v5  ;;  %660 = vmatpush.xpose.msk.msra.mxu0 %vm343_vm0, %v309_v5 }
  0x2c   : > { %515 = vperm.xlu2 %742, %v512_v47  }
  0x2f   : > { %690 = vmatpush.xpose.msk.msra.mxu3 %vm343_vm0, %v308_v6  ;;  %661 = vmatpush.xpose.msk.msra.mxu0 %vm343_vm0, %v308_v6 }
  0x33   : > { %691 = vmatpush.xpose.msk.msra.mxu3 %vm343_vm0, %v307_v7  ;;  %662 = vmatpush.xpose.msk.msra.mxu0 %vm343_vm0, %v307_v7 }
  0x37   : > { %692 = vmatpush.xpose.msk.msra.mxu3 %vm343_vm0, %v306_v8  ;;  %663 = vmatpush.xpose.msk.msra.mxu0 %vm343_vm0, %v306_v8 }
  0x3b   : > { %693 = vmatpush.xpose.msk.msra.mxu3 %vm343_vm0, %v305_v9  ;;  %664 = vmatpush.xpose.msk.msra.mxu0 %vm343_vm0, %v305_v9 }
  0x3f   : > { %694 = vmatpush.xpose.msk.msra.mxu3 %vm343_vm0, %v304_v10  ;;  %665 = vmatpush.xpose.msk.msra.mxu0 %vm343_vm0, %v304_v10 }
  0x43   : > { %695 = vmatpush.xpose.msk.msra.mxu3 %vm343_vm0, %v303_v13  ;;  %666 = vmatpush.xpose.msk.msra.mxu0 %vm343_vm0, %v303_v13 }
  0x47   : > { %696 = vmatpush.xpose.msk.msra.mxu3 %vm343_vm0, %v302_v15  ;;  %667 = vmatpush.xpose.msk.msra.mxu0 %vm343_vm0, %v302_v15 }
  0x4b   : > { %697 = vmatpush.xpose.msk.msra.mxu3 %vm343_vm0, %v301_v18  ;;  %668 = vmatpush.xpose.msk.msra.mxu0 %vm343_vm0, %v301_v18 }
  0x4f   : > { %698 = vmatpush.xpose.msk.msra.mxu3 %vm343_vm0, %v300_v19  ;;  %669 = vmatpush.xpose.msk.msra.mxu0 %vm343_vm0, %v300_v19 }
  0x53   : > { %699 = vmatpush.xpose.msk.msra.mxu3 %vm343_vm0, %v299_v22  ;;  %670 = vmatpush.xpose.msk.msra.mxu0 %vm343_vm0, %v299_v22 }
  0x56   : > { %672 = vmatmul.msk.f32.vlgmr.msra.gmra.mxu3 %vm343_vm0, %v316_v23  ;;  %671 = vmatmul.msk.f32.vlgmr.msra.gmra.mxu0 %vm343_vm0, %v315_v24 }
  0x5e   : > { %673 = vmatmul.msk.f32.gmra.mxu3 %vm343_vm0, %v317_v25 }
  0x66   : > { %674 = vmatmul.msk.f32.gmra.mxu3 %vm343_vm0, %v318_v26 }
  0x76   : > { %v463_v52 = vpop.permute.xlu2 %462 }
  0x7e   : > { %v458_v54 = vpop.permute.xlu2 %457 }
  0x86   : > { %v516_v3 = vpop.permute.xlu2 %515 }
  0x87   : > { %v341_v28 = vpop.permute.xlu0 %340  ;;  %v331_v30 = vpop.permute.xlu1 %330 }
  0x8f   : > { %v336_v31 = vpop.permute.xlu0 %335  ;;  %v326_v37 = vpop.permute.xlu1 %325 }
  0x97   : > { %v453_v58 = vpop.permute.xlu0 %452  ;;  %v448_v60 = vpop.permute.xlu1 %447 }
  0xd3   : > { %v421_v35 = vpop.f32.mrf.mxu0 }
  0xd4   : > { %v422_v38 = vadd.f32 %v421_v35, %v326_v37 }
  0xd9   : > { %v424_v27 = vpop.f32.mrf.mxu3 }
  0xda   : > { %v425_v36 = vadd.f32 %v424_v27, %v331_v30 }
  0xe1   : > { %v427_v29 = vpop.f32.mrf.mxu3 }
  0xe2   : > { %v428_v33 = vadd.f32 %v427_v29, %v336_v31 }
  0xe9   : > { %v430_v32 = vpop.f32.mrf.mxu3 }
  0xea   : > { %v431_v34 = vadd.f32 %v430_v32, %v341_v28 }
  0xec   : > { %743 = vtanh.f32 %v431_v34 }
  0xed   : > { %745 = vtanh.f32 %v428_v33 }
  0xee   : > { %747 = vtanh.f32 %v425_v36 }
  0xef   : > { %749 = vtanh.f32 %v422_v38 }
  0xf2   : > { %v744_v39 = vpop.eup %743 }
  0xf3   : > { %490 = vmatpush.msra.mxu1 %v744_v39  ;;  %v746_v41 = vpop.eup %745 }
  0xf4   : > { %v748_v42 = vpop.eup %747 }
  0xf5   : > { %491 = vmatpush.msra.mxu1 %v746_v41  ;;  %v750_v44 = vpop.eup %749 }
  0xf7   : > { %492 = vmatpush.msra.mxu1 %v748_v42 }
  0xf9   : > { %493 = vmatpush.msra.mxu1 %v750_v44 }
  0xfa   : > { %675 = vmatmul.msk.f32.vlgmr.msra.gmra.mxu1 %vm465_vm1, %v437_v43 }
 0x102   : > { %676 = vmatmul.msk.f32.gmra.mxu1 %vm465_vm1, %v438_v46 }
 0x10a   : > { %677 = vmatmul.msk.f32.gmra.mxu1 %vm465_vm1, %v439_v48 }
 0x112   : > { %678 = vmatmul.msk.f32.gmra.mxu1 %vm465_vm1, %v440_v49 }
 0x177   : > { %v495_v50 = vpop.f32.mrf.mxu1 }
 0x178   : > { %v496_v61 = vadd.f32 %v495_v50, %v448_v60 }
 0x17f   : > { %v498_v51 = vpop.f32.mrf.mxu1 }
 0x180   : > { %v499_v59 = vadd.f32 %v498_v51, %v453_v58 }
 0x187   : > { %v501_v53 = vpop.f32.mrf.mxu1 }
 0x188   : > { %v502_v56 = vadd.f32 %v501_v53, %v458_v54 }
 0x18f   : > { %v504_v55 = vpop.f32.mrf.mxu1 }
 0x190   : > { %v505_v57 = vadd.f32 %v504_v55, %v463_v52 }
 0x192   : > { %751 = vtanh.f32 %v505_v57 }
 0x193   : > { %753 = vtanh.f32 %v502_v56 }
 0x194   : > { %755 = vtanh.f32 %v499_v59 }
 0x195   : > { %757 = vtanh.f32 %v496_v61 }
 0x198   : > { %v752_v62 = vpop.eup %751 }
 0x199   : > { %533 = vmatpush.msra.mxu2 %v752_v62  ;;  %v754_v63 = vpop.eup %753 }
 0x19a   : > { %v756_v0 = vpop.eup %755 }
 0x19b   : > { %534 = vmatpush.msra.mxu2 %v754_v63  ;;  %v758_v2 = vpop.eup %757 }
 0x19d   : > { %535 = vmatpush.msra.mxu2 %v756_v0 }
 0x19f   : > { %536 = vmatpush.msra.mxu2 %v758_v2 }
 0x1a0   : > { %679 = vmatmul.msk.f32.vlgmr.msra.gmra.mxu2 %vm465_vm1, %v511_v1 }
 0x223   : > { %v538_v4 = vpop.f32.mrf.mxu2 }
 0x224   : > { %v539_v5 = vadd.f32 %v538_v4, %v516_v3 }
 0x226   : > { %v541_v6 = vrot.slane %v539_v5, 4 }
 0x228   : > { %v542_v7 = vmax.f32 %v539_v5, %v541_v6 }
 0x22a   : > { %v543_v8 = vrot.slane %v542_v7, 2 }
 0x22c   : > { %v544_v9 = vmax.f32 %v542_v7, %v543_v8 }
 0x22e   : > { %v545_v10 = vrot.slane %v544_v9, 1 }
 0x230   : > { %v546_v11 = vmax.f32 %v544_v9, %v545_v10 }
 0x232   : > { %v547_v12 = vsub.f32 %v539_v5, %v546_v11 }
 0x234   : > { %v548_v13 = vmul.f32 1.442695, %v547_v12 }
 0x236   : > { %759 = vpow2.f32 %v548_v13 }
 0x23c   : > { %v760_v14 = vpop.eup %759 }
 0x23d   : > { %v550_v15 = vrot.slane %v760_v14, 4 }
 0x23f   : > { %v551_v16 = vadd.f32 %v760_v14, %v550_v15 }
 0x241   : > { %v552_v17 = vrot.slane %v551_v16, 2 }
 0x243   : > { %v553_v18 = vadd.f32 %v552_v17, %v551_v16 }
 0x245   : > { %v554_v19 = vrot.slane %v553_v18, 1 }
 0x247   : > { %v555_v20 = vadd.f32 %v554_v19, %v553_v18 }
 0x249   : > { %761 = vrcp.f32 %v555_v20  ;;  %v567_v24 = vand.u32 2147483648, %v555_v20  ;;  %v565_v26 = vand.u32 2147483647, %v555_v20  ;;  %vm561_vm3 = vweird.f32 %v555_v20 }
 0x24b   : > { %v568_v28 = vor.u32 1.1754944e-38, %v567_v24  ;;  %vm566_vm5 = vcmp.eq.f32.partialorder %v565_v26, 8.507059e+37 }
 0x24f   : > { %v762_v21 = vpop.eup %761 }
 0x250   : > { %v557_v22 = vmul.f32 %v762_v21, %v555_v20  ;;  %vm562_vm2 = vweird.f32 %v762_v21 }
 0x251   : > { %vm563_vm4 = vmor %vm561_vm3, %vm562_vm2 }
 0x252   : > { %v558_v23 = vsub.f32 1.0, %v557_v22 }
 0x254   : > { %v559_v25 = vmul.f32 %v762_v21, %v558_v23 }
 0x256   : > { %v560_v27 = vadd.f32 %v762_v21, %v559_v25 }
 0x258   : > { %v564_v29 = vsel %vm563_vm4, %v762_v21, %v560_v27 }
 0x259   : > { %v569_v30 = vsel %vm566_vm5, %v568_v28, %v564_v29 }
 0x25a   : > { %v571_v31 = vmul.f32 %v760_v14, %v569_v30 }
 0x25c   : > { %572 = vst [vmem:[%s284_s19] sm:$0xff] %v571_v31 }
 0x25d   : > { %790 = shalt.err (!%p787_p3)
}
 0x25e   : > { %700 = dma.vmem_to_hbm [thread:$0]  (%p906_p5), %s587_s20, 128, %s589_s21, %s574_s28  }
 0x25f PF: > { %p706_p4 = scmp.ge.s32.totalorder %s825_s27, 2  ;;  %s600_s9 = sand.u32 1, %s813_s24  }
 0x260   : > { %s601_s15 = scalar_lea.sflag [#allocation3], %s600_s9 }
 0x261   : > { %p703_p7 = pnand %p706_p4, %p910_p6 }
 0x263   : > { %p704_p8 = pneg %p703_p7 }
 0x265   : > { %808 = dma.done.wait (%p704_p8), %s601_s15, 128  }
 0x266   : > { %810 = vsyncadd (%p704_p8), %s601_s15, 4294967168  ;;  %p17_p9 = scmp.ge.s32.totalorder %s893_s30, 4   ;;  %s1075_s24 = smov %s817_s25 }
 0x267   : > { %s1076_s25 = smov %s821_s26  ;;  %s1077_s26 = smov %s904_s10 }
 0x268   : > { %s1078_s27 = smov %s893_s30  ;;  %19 = sbr.rel (!%p17_p9) target bundleno = 3 (0x3), region = 83 }
 0x26d   :  { %607 = vsyncpa [#allocation3], 1 }
 0x26e   :  { %609 = vsyncpa [#allocation3 + $0x1], 1 }

</bundles_post_ra>
